<compile_context>
chip_gen: v7x
topology: tpu7x:2x2x1
jax: 0.10.0
libtpu: 0.0.40
codegen_flags: <defaults>
</compile_context>

<pallas_src>
import numpy as np
import jax
import jax.numpy as jnp
from jax.experimental import pallas as pl
from jax.experimental.pallas import tpu as pltpu


def csm_loss(s_reps, s_atten, t_reps, t_atten, epoch, *, center, ncrops,
             teacher_temp_schedule, student_temp=0.1, center_momentum=0.9):
    s_qk, s_vv = s_atten
    t_qk, t_vv = t_atten

    two_b, out_dim = t_reps.shape
    b = two_b // 2
    assert s_reps.shape == (ncrops * b, out_dim)
    assert ncrops >= 2
    a_dim = s_qk.shape[-1]
    assert s_qk.shape == s_vv.shape == t_qk.shape == t_vv.shape == (two_b, a_dim)

    # ---- compile-time constants (no runtime params operand, no divides) ----
    inv_temp = 1.0 / float(teacher_temp_schedule[epoch])
    inv_student_temp = 1.0 / float(student_temp)
    momentum = float(center_momentum)
    n_rep_terms = 2 * ncrops - 2
    n_att_terms = 2
    eps = 1e-10

    def _kernel(t_ref, c_ref, s_ref, s_qk_ref, s_vv_ref, t_qk_ref, t_vv_ref,
                rep_ref, att_ref, center_ref):
        c = c_ref[...]                                            # (1, D)
        t_all = t_ref[...]                                        # (2B, D)

        # ---- teacher softmax, computed ONCE for both global chunks ----
        t = (t_all - c) * inv_temp
        t = t - jnp.max(t, axis=-1, keepdims=True)
        t_exp = jnp.exp(t)
        inv_zt = 1.0 / jnp.sum(t_exp, axis=-1, keepdims=True)     # (2B,1) recips only
        t_soft = t_exp * inv_zt                                   # rows sum to 1

        # ---- student log-softmax pieces for ALL crops in one pass ----
        s = s_ref[...] * inv_student_temp                         # (ncrops*B, D)
        s_shift = s - jnp.max(s, axis=-1, keepdims=True)
        log_z = jnp.log(jnp.sum(jnp.exp(s_shift), axis=-1, keepdims=True))  # (ncrops*B,1)

        # ---- representation CE:  ce = log_z - <t_soft, s_shift>  ----
        rep_acc = jnp.zeros((1, 1), jnp.float32)
        for iq in range(2):
            tq = t_soft[iq * b:(iq + 1) * b, :]                   # (B, D) static slice
            for v in range(ncrops):
                if v < 2 and v == iq:
                    continue
                sv = s_shift[v * b:(v + 1) * b, :]
                lz = log_z[v * b:(v + 1) * b, :]
                ce = lz - jnp.sum(tq * sv, axis=-1, keepdims=True)       # (B, 1)
                rep_acc = rep_acc + jnp.sum(ce, axis=0, keepdims=True)   # (1, 1)
        rep_ref[...] = rep_acc * (1.0 / (b * n_rep_terms))

        # ---- attention KL (only the two matched global crops) ----
        s_qk_all = s_qk_ref[...]
        s_vv_all = s_vv_ref[...]
        t_qk_all = t_qk_ref[...]
        t_vv_all = t_vv_ref[...]
        att_acc = jnp.zeros((1, 1), jnp.float32)
        for iq in range(2):
            sl = slice(iq * b, (iq + 1) * b)
            for s_a, t_a in ((s_qk_all[sl, :], t_qk_all[sl, :]),
                             (s_vv_all[sl, :], t_vv_all[sl, :])):
                se = s_a + eps
                te = t_a + eps
                # single-log KL: t*(log t - log s) == t*log(t * (1/s));
                # approx recip rides the cheap EUP path (small precision delta).
                kl = te * jnp.log(te * pl.reciprocal(se, approx=True))
                row = jnp.sum(kl, axis=-1, keepdims=True)                # (B, 1)
                att_acc = att_acc + jnp.sum(row, axis=0, keepdims=True)  # (1, 1)
        att_ref[...] = att_acc * (1.0 / (b * n_att_terms))

        # ---- center EMA (teacher block already resident in VMEM) ----
        # TODO(synk): dist.all_reduce / world_size not translated; single device assumed.
        batch_center = jnp.sum(t_all, axis=0, keepdims=True) * (1.0 / two_b)
        center_ref[...] = c * momentum + batch_center * (1.0 - momentum)

    rep, att, new_center = pl.pallas_call(
        _kernel,
        out_shape=(jax.ShapeDtypeStruct((1, 1), jnp.float32),
                   jax.ShapeDtypeStruct((1, 1), jnp.float32),
                   jax.ShapeDtypeStruct((1, out_dim), jnp.float32)),
        in_specs=[pl.BlockSpec(memory_space=pltpu.MemorySpace.VMEM)
                  for _ in range(7)],
        out_specs=(pl.BlockSpec(memory_space=pltpu.MemorySpace.VMEM),
                   pl.BlockSpec(memory_space=pltpu.MemorySpace.VMEM),
                   pl.BlockSpec(memory_space=pltpu.MemorySpace.VMEM)),
    )(t_reps, center, s_reps, s_qk, s_vv, t_qk, t_vv)

    return {"csm_rep_loss": rep[0, 0], "csm_att_loss": att[0, 0]}, new_center


if __name__ == "__main__":
    # module hyper-params (deterministic, in-script)
    out_dim = 256
    ncrops = 6
    B = 8            # per-crop batch
    A = 128          # attention distribution length
    warmup_teacher_temp, teacher_temp = 0.04, 0.07
    warmup_teacher_temp_epochs, nepochs = 3, 10
    student_temp, center_momentum = 0.1, 0.9
    epoch = 1

    teacher_temp_schedule = np.concatenate((
        np.linspace(warmup_teacher_temp, teacher_temp, warmup_teacher_temp_epochs),
        np.ones(nepochs - warmup_teacher_temp_epochs) * teacher_temp))

    key = jax.random.PRNGKey(0)
    k = jax.random.split(key, 6)
    s_reps = jax.random.normal(k[0], (ncrops * B, out_dim), jnp.float32)
    t_reps = jax.random.normal(k[1], (2 * B, out_dim), jnp.float32)
    # attention maps: rows are probability distributions
    s_qk = jax.nn.softmax(jax.random.normal(k[2], (2 * B, A), jnp.float32), axis=-1)
    s_vv = jax.nn.softmax(jax.random.normal(k[3], (2 * B, A), jnp.float32), axis=-1)
    t_qk = jax.nn.softmax(jax.random.normal(k[4], (2 * B, A), jnp.float32), axis=-1)
    t_vv = jax.nn.softmax(jax.random.normal(k[5], (2 * B, A), jnp.float32), axis=-1)
    center = jnp.zeros((1, out_dim), jnp.float32)    # registered buffer, init zeros

    losses, new_center = csm_loss(
        s_reps, (s_qk, s_vv), t_reps, (t_qk, t_vv), epoch,
        center=center, ncrops=ncrops,
        teacher_temp_schedule=teacher_temp_schedule,
        student_temp=student_temp, center_momentum=center_momentum)

    jax.block_until_ready((losses, new_center))
    print("KERNEL_OK")
</pallas_src>

<mosaic_0001>
module attributes {stable_mosaic.version = 11 : i64} {
  func.func @_kernel(%arg0: memref<16x256xf32, #tpu.memory_space<vmem>>, %arg1: memref<1x256xf32, #tpu.memory_space<vmem>>, %arg2: memref<48x256xf32, #tpu.memory_space<vmem>>, %arg3: memref<16x128xf32, #tpu.memory_space<vmem>>, %arg4: memref<16x128xf32, #tpu.memory_space<vmem>>, %arg5: memref<16x128xf32, #tpu.memory_space<vmem>>, %arg6: memref<16x128xf32, #tpu.memory_space<vmem>>, %arg7: memref<1x1xf32, #tpu.memory_space<vmem>>, %arg8: memref<1x1xf32, #tpu.memory_space<vmem>>, %arg9: memref<1x256xf32, #tpu.memory_space<vmem>>) attributes {dimension_semantics = [], scalar_prefetch = 0 : i64, scratch_operands = 0 : i64, tpu.core_type = #tpu.core_type<tc>} {
    %c0 = arith.constant 0 : index
    %c0_0 = arith.constant 0 : index
    %0 = vector.load %arg1[%c0, %c0_0] : memref<1x256xf32, #tpu.memory_space<vmem>>, vector<1x256xf32>
    %c0_1 = arith.constant 0 : index
    %c0_2 = arith.constant 0 : index
    %1 = vector.load %arg0[%c0_1, %c0_2] : memref<16x256xf32, #tpu.memory_space<vmem>>, vector<16x256xf32>
    %2 = vector.broadcast %0 : vector<1x256xf32> to vector<16x256xf32>
    %3 = arith.subf %1, %2 : vector<16x256xf32>
    %cst = arith.constant 18.181818 : f32
    %4 = vector.broadcast %cst : f32 to vector<16x256xf32>
    %5 = arith.mulf %3, %4 : vector<16x256xf32>
    %cst_3 = arith.constant dense<0xFF800000> : vector<16xf32>
    %6 = vector.multi_reduction <maximumf>, %5, %cst_3 [1] : vector<16x256xf32> to vector<16xf32>
    %7 = vector.shape_cast %6 : vector<16xf32> to vector<16x1xf32>
    %8 = vector.broadcast %7 : vector<16x1xf32> to vector<16x256xf32>
    %9 = arith.subf %5, %8 : vector<16x256xf32>
    %10 = math.exp %9 : vector<16x256xf32>
    %cst_4 = arith.constant dense<0.000000e+00> : vector<16xf32>
    %11 = vector.multi_reduction <add>, %10, %cst_4 [1] : vector<16x256xf32> to vector<16xf32>
    %12 = vector.shape_cast %11 : vector<16xf32> to vector<16x1xf32>
    %cst_5 = arith.constant 1.000000e+00 : f32
    %13 = vector.broadcast %cst_5 : f32 to vector<16x1xf32>
    %14 = arith.divf %13, %12 : vector<16x1xf32>
    %15 = vector.broadcast %14 : vector<16x1xf32> to vector<16x256xf32>
    %16 = arith.mulf %10, %15 : vector<16x256xf32>
    %c0_6 = arith.constant 0 : index
    %c0_7 = arith.constant 0 : index
    %17 = vector.load %arg2[%c0_6, %c0_7] : memref<48x256xf32, #tpu.memory_space<vmem>>, vector<48x256xf32>
    %cst_8 = arith.constant 1.000000e+01 : f32
    %18 = vector.broadcast %cst_8 : f32 to vector<48x256xf32>
    %19 = arith.mulf %17, %18 : vector<48x256xf32>
    %cst_9 = arith.constant dense<0xFF800000> : vector<48xf32>
    %20 = vector.multi_reduction <maximumf>, %19, %cst_9 [1] : vector<48x256xf32> to vector<48xf32>
    %21 = vector.shape_cast %20 : vector<48xf32> to vector<48x1xf32>
    %22 = vector.broadcast %21 : vector<48x1xf32> to vector<48x256xf32>
    %23 = arith.subf %19, %22 : vector<48x256xf32>
    %24 = math.exp %23 : vector<48x256xf32>
    %cst_10 = arith.constant dense<0.000000e+00> : vector<48xf32>
    %25 = vector.multi_reduction <add>, %24, %cst_10 [1] : vector<48x256xf32> to vector<48xf32>
    %26 = vector.shape_cast %25 : vector<48xf32> to vector<48x1xf32>
    %27 = math.log %26 : vector<48x1xf32>
    %cst_11 = arith.constant 0.000000e+00 : f32
    %28 = vector.broadcast %cst_11 : f32 to vector<1x1xf32>
    %29 = vector.extract_strided_slice %16 {offsets = [0, 0], sizes = [8, 256], strides = [1, 1]} : vector<16x256xf32> to vector<8x256xf32>
    %30 = vector.extract_strided_slice %23 {offsets = [8, 0], sizes = [8, 256], strides = [1, 1]} : vector<48x256xf32> to vector<8x256xf32>
    %31 = vector.extract_strided_slice %27 {offsets = [8, 0], sizes = [8, 1], strides = [1, 1]} : vector<48x1xf32> to vector<8x1xf32>
    %32 = arith.mulf %29, %30 : vector<8x256xf32>
    %cst_12 = arith.constant dense<0.000000e+00> : vector<8xf32>
    %33 = vector.multi_reduction <add>, %32, %cst_12 [1] : vector<8x256xf32> to vector<8xf32>
    %34 = vector.shape_cast %33 : vector<8xf32> to vector<8x1xf32>
    %35 = arith.subf %31, %34 : vector<8x1xf32>
    %cst_13 = arith.constant dense<0.000000e+00> : vector<1xf32>
    %36 = vector.multi_reduction <add>, %35, %cst_13 [0] : vector<8x1xf32> to vector<1xf32>
    %37 = vector.shape_cast %36 : vector<1xf32> to vector<1x1xf32>
    %38 = arith.addf %28, %37 : vector<1x1xf32>
    %39 = vector.extract_strided_slice %23 {offsets = [16, 0], sizes = [8, 256], strides = [1, 1]} : vector<48x256xf32> to vector<8x256xf32>
    %40 = vector.extract_strided_slice %27 {offsets = [16, 0], sizes = [8, 1], strides = [1, 1]} : vector<48x1xf32> to vector<8x1xf32>
    %41 = arith.mulf %29, %39 : vector<8x256xf32>
    %cst_14 = arith.constant dense<0.000000e+00> : vector<8xf32>
    %42 = vector.multi_reduction <add>, %41, %cst_14 [1] : vector<8x256xf32> to vector<8xf32>
    %43 = vector.shape_cast %42 : vector<8xf32> to vector<8x1xf32>
    %44 = arith.subf %40, %43 : vector<8x1xf32>
    %cst_15 = arith.constant dense<0.000000e+00> : vector<1xf32>
    %45 = vector.multi_reduction <add>, %44, %cst_15 [0] : vector<8x1xf32> to vector<1xf32>
    %46 = vector.shape_cast %45 : vector<1xf32> to vector<1x1xf32>
    %47 = arith.addf %38, %46 : vector<1x1xf32>
    %48 = vector.extract_strided_slice %23 {offsets = [24, 0], sizes = [8, 256], strides = [1, 1]} : vector<48x256xf32> to vector<8x256xf32>
    %49 = vector.extract_strided_slice %27 {offsets = [24, 0], sizes = [8, 1], strides = [1, 1]} : vector<48x1xf32> to vector<8x1xf32>
    %50 = arith.mulf %29, %48 : vector<8x256xf32>
    %cst_16 = arith.constant dense<0.000000e+00> : vector<8xf32>
    %51 = vector.multi_reduction <add>, %50, %cst_16 [1] : vector<8x256xf32> to vector<8xf32>
    %52 = vector.shape_cast %51 : vector<8xf32> to vector<8x1xf32>
    %53 = arith.subf %49, %52 : vector<8x1xf32>
    %cst_17 = arith.constant dense<0.000000e+00> : vector<1xf32>
    %54 = vector.multi_reduction <add>, %53, %cst_17 [0] : vector<8x1xf32> to vector<1xf32>
    %55 = vector.shape_cast %54 : vector<1xf32> to vector<1x1xf32>
    %56 = arith.addf %47, %55 : vector<1x1xf32>
    %57 = vector.extract_strided_slice %23 {offsets = [32, 0], sizes = [8, 256], strides = [1, 1]} : vector<48x256xf32> to vector<8x256xf32>
    %58 = vector.extract_strided_slice %27 {offsets = [32, 0], sizes = [8, 1], strides = [1, 1]} : vector<48x1xf32> to vector<8x1xf32>
    %59 = arith.mulf %29, %57 : vector<8x256xf32>
    %cst_18 = arith.constant dense<0.000000e+00> : vector<8xf32>
    %60 = vector.multi_reduction <add>, %59, %cst_18 [1] : vector<8x256xf32> to vector<8xf32>
    %61 = vector.shape_cast %60 : vector<8xf32> to vector<8x1xf32>
    %62 = arith.subf %58, %61 : vector<8x1xf32>
    %cst_19 = arith.constant dense<0.000000e+00> : vector<1xf32>
    %63 = vector.multi_reduction <add>, %62, %cst_19 [0] : vector<8x1xf32> to vector<1xf32>
    %64 = vector.shape_cast %63 : vector<1xf32> to vector<1x1xf32>
    %65 = arith.addf %56, %64 : vector<1x1xf32>
    %66 = vector.extract_strided_slice %23 {offsets = [40, 0], sizes = [8, 256], strides = [1, 1]} : vector<48x256xf32> to vector<8x256xf32>
    %67 = vector.extract_strided_slice %27 {offsets = [40, 0], sizes = [8, 1], strides = [1, 1]} : vector<48x1xf32> to vector<8x1xf32>
    %68 = arith.mulf %29, %66 : vector<8x256xf32>
    %cst_20 = arith.constant dense<0.000000e+00> : vector<8xf32>
    %69 = vector.multi_reduction <add>, %68, %cst_20 [1] : vector<8x256xf32> to vector<8xf32>
    %70 = vector.shape_cast %69 : vector<8xf32> to vector<8x1xf32>
    %71 = arith.subf %67, %70 : vector<8x1xf32>
    %cst_21 = arith.constant dense<0.000000e+00> : vector<1xf32>
    %72 = vector.multi_reduction <add>, %71, %cst_21 [0] : vector<8x1xf32> to vector<1xf32>
    %73 = vector.shape_cast %72 : vector<1xf32> to vector<1x1xf32>
    %74 = arith.addf %65, %73 : vector<1x1xf32>
    %75 = vector.extract_strided_slice %16 {offsets = [8, 0], sizes = [8, 256], strides = [1, 1]} : vector<16x256xf32> to vector<8x256xf32>
    %76 = vector.extract_strided_slice %23 {offsets = [0, 0], sizes = [8, 256], strides = [1, 1]} : vector<48x256xf32> to vector<8x256xf32>
    %77 = vector.extract_strided_slice %27 {offsets = [0, 0], sizes = [8, 1], strides = [1, 1]} : vector<48x1xf32> to vector<8x1xf32>
    %78 = arith.mulf %75, %76 : vector<8x256xf32>
    %cst_22 = arith.constant dense<0.000000e+00> : vector<8xf32>
    %79 = vector.multi_reduction <add>, %78, %cst_22 [1] : vector<8x256xf32> to vector<8xf32>
    %80 = vector.shape_cast %79 : vector<8xf32> to vector<8x1xf32>
    %81 = arith.subf %77, %80 : vector<8x1xf32>
    %cst_23 = arith.constant dense<0.000000e+00> : vector<1xf32>
    %82 = vector.multi_reduction <add>, %81, %cst_23 [0] : vector<8x1xf32> to vector<1xf32>
    %83 = vector.shape_cast %82 : vector<1xf32> to vector<1x1xf32>
    %84 = arith.addf %74, %83 : vector<1x1xf32>
    %85 = vector.extract_strided_slice %23 {offsets = [16, 0], sizes = [8, 256], strides = [1, 1]} : vector<48x256xf32> to vector<8x256xf32>
    %86 = vector.extract_strided_slice %27 {offsets = [16, 0], sizes = [8, 1], strides = [1, 1]} : vector<48x1xf32> to vector<8x1xf32>
    %87 = arith.mulf %75, %85 : vector<8x256xf32>
    %cst_24 = arith.constant dense<0.000000e+00> : vector<8xf32>
    %88 = vector.multi_reduction <add>, %87, %cst_24 [1] : vector<8x256xf32> to vector<8xf32>
    %89 = vector.shape_cast %88 : vector<8xf32> to vector<8x1xf32>
    %90 = arith.subf %86, %89 : vector<8x1xf32>
    %cst_25 = arith.constant dense<0.000000e+00> : vector<1xf32>
    %91 = vector.multi_reduction <add>, %90, %cst_25 [0] : vector<8x1xf32> to vector<1xf32>
    %92 = vector.shape_cast %91 : vector<1xf32> to vector<1x1xf32>
    %93 = arith.addf %84, %92 : vector<1x1xf32>
    %94 = vector.extract_strided_slice %23 {offsets = [24, 0], sizes = [8, 256], strides = [1, 1]} : vector<48x256xf32> to vector<8x256xf32>
    %95 = vector.extract_strided_slice %27 {offsets = [24, 0], sizes = [8, 1], strides = [1, 1]} : vector<48x1xf32> to vector<8x1xf32>
    %96 = arith.mulf %75, %94 : vector<8x256xf32>
    %cst_26 = arith.constant dense<0.000000e+00> : vector<8xf32>
    %97 = vector.multi_reduction <add>, %96, %cst_26 [1] : vector<8x256xf32> to vector<8xf32>
    %98 = vector.shape_cast %97 : vector<8xf32> to vector<8x1xf32>
    %99 = arith.subf %95, %98 : vector<8x1xf32>
    %cst_27 = arith.constant dense<0.000000e+00> : vector<1xf32>
    %100 = vector.multi_reduction <add>, %99, %cst_27 [0] : vector<8x1xf32> to vector<1xf32>
    %101 = vector.shape_cast %100 : vector<1xf32> to vector<1x1xf32>
    %102 = arith.addf %93, %101 : vector<1x1xf32>
    %103 = vector.extract_strided_slice %23 {offsets = [32, 0], sizes = [8, 256], strides = [1, 1]} : vector<48x256xf32> to vector<8x256xf32>
    %104 = vector.extract_strided_slice %27 {offsets = [32, 0], sizes = [8, 1], strides = [1, 1]} : vector<48x1xf32> to vector<8x1xf32>
    %105 = arith.mulf %75, %103 : vector<8x256xf32>
    %cst_28 = arith.constant dense<0.000000e+00> : vector<8xf32>
    %106 = vector.multi_reduction <add>, %105, %cst_28 [1] : vector<8x256xf32> to vector<8xf32>
    %107 = vector.shape_cast %106 : vector<8xf32> to vector<8x1xf32>
    %108 = arith.subf %104, %107 : vector<8x1xf32>
    %cst_29 = arith.constant dense<0.000000e+00> : vector<1xf32>
    %109 = vector.multi_reduction <add>, %108, %cst_29 [0] : vector<8x1xf32> to vector<1xf32>
    %110 = vector.shape_cast %109 : vector<1xf32> to vector<1x1xf32>
    %111 = arith.addf %102, %110 : vector<1x1xf32>
    %112 = vector.extract_strided_slice %23 {offsets = [40, 0], sizes = [8, 256], strides = [1, 1]} : vector<48x256xf32> to vector<8x256xf32>
    %113 = vector.extract_strided_slice %27 {offsets = [40, 0], sizes = [8, 1], strides = [1, 1]} : vector<48x1xf32> to vector<8x1xf32>
    %114 = arith.mulf %75, %112 : vector<8x256xf32>
    %cst_30 = arith.constant dense<0.000000e+00> : vector<8xf32>
    %115 = vector.multi_reduction <add>, %114, %cst_30 [1] : vector<8x256xf32> to vector<8xf32>
    %116 = vector.shape_cast %115 : vector<8xf32> to vector<8x1xf32>
    %117 = arith.subf %113, %116 : vector<8x1xf32>
    %cst_31 = arith.constant dense<0.000000e+00> : vector<1xf32>
    %118 = vector.multi_reduction <add>, %117, %cst_31 [0] : vector<8x1xf32> to vector<1xf32>
    %119 = vector.shape_cast %118 : vector<1xf32> to vector<1x1xf32>
    %120 = arith.addf %111, %119 : vector<1x1xf32>
    %cst_32 = arith.constant 1.250000e-02 : f32
    %121 = vector.broadcast %cst_32 : f32 to vector<1x1xf32>
    %122 = arith.mulf %120, %121 : vector<1x1xf32>
    %c0_33 = arith.constant 0 : index
    %c0_34 = arith.constant 0 : index
    %123 = vector.load %arg7[%c0_33, %c0_34] : memref<1x1xf32, #tpu.memory_space<vmem>>, vector<1x1xf32>
    tpu.vector_store %arg7[%c0_33, %c0_34], %122 {strides = array<i32>} : memref<1x1xf32, #tpu.memory_space<vmem>>, vector<1x1xf32>,
    %c0_35 = arith.constant 0 : index
    %c0_36 = arith.constant 0 : index
    %124 = vector.load %arg3[%c0_35, %c0_36] : memref<16x128xf32, #tpu.memory_space<vmem>>, vector<16x128xf32>
    %c0_37 = arith.constant 0 : index
    %c0_38 = arith.constant 0 : index
    %125 = vector.load %arg4[%c0_37, %c0_38] : memref<16x128xf32, #tpu.memory_space<vmem>>, vector<16x128xf32>
    %c0_39 = arith.constant 0 : index
    %c0_40 = arith.constant 0 : index
    %126 = vector.load %arg5[%c0_39, %c0_40] : memref<16x128xf32, #tpu.memory_space<vmem>>, vector<16x128xf32>
    %c0_41 = arith.constant 0 : index
    %c0_42 = arith.constant 0 : index
    %127 = vector.load %arg6[%c0_41, %c0_42] : memref<16x128xf32, #tpu.memory_space<vmem>>, vector<16x128xf32>
    %cst_43 = arith.constant 0.000000e+00 : f32
    %128 = vector.broadcast %cst_43 : f32 to vector<1x1xf32>
    %129 = vector.extract_strided_slice %124 {offsets = [0, 0], sizes = [8, 128], strides = [1, 1]} : vector<16x128xf32> to vector<8x128xf32>
    %130 = vector.extract_strided_slice %126 {offsets = [0, 0], sizes = [8, 128], strides = [1, 1]} : vector<16x128xf32> to vector<8x128xf32>
    %131 = vector.extract_strided_slice %125 {offsets = [0, 0], sizes = [8, 128], strides = [1, 1]} : vector<16x128xf32> to vector<8x128xf32>
    %132 = vector.extract_strided_slice %127 {offsets = [0, 0], sizes = [8, 128], strides = [1, 1]} : vector<16x128xf32> to vector<8x128xf32>
    %cst_44 = arith.constant 1.000000e-10 : f32
    %133 = vector.broadcast %cst_44 : f32 to vector<8x128xf32>
    %134 = arith.addf %129, %133 : vector<8x128xf32>
    %cst_45 = arith.constant 1.000000e-10 : f32
    %135 = vector.broadcast %cst_45 : f32 to vector<8x128xf32>
    %136 = arith.addf %130, %135 : vector<8x128xf32>
    %137 = tpu.reciprocal %134 {approx = true} : vector<8x128xf32> -> vector<8x128xf32>
    %138 = arith.mulf %136, %137 : vector<8x128xf32>
    %139 = math.log %138 : vector<8x128xf32>
    %140 = arith.mulf %136, %139 : vector<8x128xf32>
    %cst_46 = arith.constant dense<0.000000e+00> : vector<8xf32>
    %141 = vector.multi_reduction <add>, %140, %cst_46 [1] : vector<8x128xf32> to vector<8xf32>
    %142 = vector.shape_cast %141 : vector<8xf32> to vector<8x1xf32>
    %cst_47 = arith.constant dense<0.000000e+00> : vector<1xf32>
    %143 = vector.multi_reduction <add>, %142, %cst_47 [0] : vector<8x1xf32> to vector<1xf32>
    %144 = vector.shape_cast %143 : vector<1xf32> to vector<1x1xf32>
    %145 = arith.addf %128, %144 : vector<1x1xf32>
    %cst_48 = arith.constant 1.000000e-10 : f32
    %146 = vector.broadcast %cst_48 : f32 to vector<8x128xf32>
    %147 = arith.addf %131, %146 : vector<8x128xf32>
    %cst_49 = arith.constant 1.000000e-10 : f32
    %148 = vector.broadcast %cst_49 : f32 to vector<8x128xf32>
    %149 = arith.addf %132, %148 : vector<8x128xf32>
    %150 = tpu.reciprocal %147 {approx = true} : vector<8x128xf32> -> vector<8x128xf32>
    %151 = arith.mulf %149, %150 : vector<8x128xf32>
    %152 = math.log %151 : vector<8x128xf32>
    %153 = arith.mulf %149, %152 : vector<8x128xf32>
    %cst_50 = arith.constant dense<0.000000e+00> : vector<8xf32>
    %154 = vector.multi_reduction <add>, %153, %cst_50 [1] : vector<8x128xf32> to vector<8xf32>
    %155 = vector.shape_cast %154 : vector<8xf32> to vector<8x1xf32>
    %cst_51 = arith.constant dense<0.000000e+00> : vector<1xf32>
    %156 = vector.multi_reduction <add>, %155, %cst_51 [0] : vector<8x1xf32> to vector<1xf32>
    %157 = vector.shape_cast %156 : vector<1xf32> to vector<1x1xf32>
    %158 = arith.addf %145, %157 : vector<1x1xf32>
    %159 = vector.extract_strided_slice %124 {offsets = [8, 0], sizes = [8, 128], strides = [1, 1]} : vector<16x128xf32> to vector<8x128xf32>
    %160 = vector.extract_strided_slice %126 {offsets = [8, 0], sizes = [8, 128], strides = [1, 1]} : vector<16x128xf32> to vector<8x128xf32>
    %161 = vector.extract_strided_slice %125 {offsets = [8, 0], sizes = [8, 128], strides = [1, 1]} : vector<16x128xf32> to vector<8x128xf32>
    %162 = vector.extract_strided_slice %127 {offsets = [8, 0], sizes = [8, 128], strides = [1, 1]} : vector<16x128xf32> to vector<8x128xf32>
    %cst_52 = arith.constant 1.000000e-10 : f32
    %163 = vector.broadcast %cst_52 : f32 to vector<8x128xf32>
    %164 = arith.addf %159, %163 : vector<8x128xf32>
    %cst_53 = arith.constant 1.000000e-10 : f32
    %165 = vector.broadcast %cst_53 : f32 to vector<8x128xf32>
    %166 = arith.addf %160, %165 : vector<8x128xf32>
    %167 = tpu.reciprocal %164 {approx = true} : vector<8x128xf32> -> vector<8x128xf32>
    %168 = arith.mulf %166, %167 : vector<8x128xf32>
    %169 = math.log %168 : vector<8x128xf32>
    %170 = arith.mulf %166, %169 : vector<8x128xf32>
    %cst_54 = arith.constant dense<0.000000e+00> : vector<8xf32>
    %171 = vector.multi_reduction <add>, %170, %cst_54 [1] : vector<8x128xf32> to vector<8xf32>
    %172 = vector.shape_cast %171 : vector<8xf32> to vector<8x1xf32>
    %cst_55 = arith.constant dense<0.000000e+00> : vector<1xf32>
    %173 = vector.multi_reduction <add>, %172, %cst_55 [0] : vector<8x1xf32> to vector<1xf32>
    %174 = vector.shape_cast %173 : vector<1xf32> to vector<1x1xf32>
    %175 = arith.addf %158, %174 : vector<1x1xf32>
    %cst_56 = arith.constant 1.000000e-10 : f32
    %176 = vector.broadcast %cst_56 : f32 to vector<8x128xf32>
    %177 = arith.addf %161, %176 : vector<8x128xf32>
    %cst_57 = arith.constant 1.000000e-10 : f32
    %178 = vector.broadcast %cst_57 : f32 to vector<8x128xf32>
    %179 = arith.addf %162, %178 : vector<8x128xf32>
    %180 = tpu.reciprocal %177 {approx = true} : vector<8x128xf32> -> vector<8x128xf32>
    %181 = arith.mulf %179, %180 : vector<8x128xf32>
    %182 = math.log %181 : vector<8x128xf32>
    %183 = arith.mulf %179, %182 : vector<8x128xf32>
    %cst_58 = arith.constant dense<0.000000e+00> : vector<8xf32>
    %184 = vector.multi_reduction <add>, %183, %cst_58 [1] : vector<8x128xf32> to vector<8xf32>
    %185 = vector.shape_cast %184 : vector<8xf32> to vector<8x1xf32>
    %cst_59 = arith.constant dense<0.000000e+00> : vector<1xf32>
    %186 = vector.multi_reduction <add>, %185, %cst_59 [0] : vector<8x1xf32> to vector<1xf32>
    %187 = vector.shape_cast %186 : vector<1xf32> to vector<1x1xf32>
    %188 = arith.addf %175, %187 : vector<1x1xf32>
    %cst_60 = arith.constant 6.250000e-02 : f32
    %189 = vector.broadcast %cst_60 : f32 to vector<1x1xf32>
    %190 = arith.mulf %188, %189 : vector<1x1xf32>
    %c0_61 = arith.constant 0 : index
    %c0_62 = arith.constant 0 : index
    %191 = vector.load %arg8[%c0_61, %c0_62] : memref<1x1xf32, #tpu.memory_space<vmem>>, vector<1x1xf32>
    tpu.vector_store %arg8[%c0_61, %c0_62], %190 {strides = array<i32>} : memref<1x1xf32, #tpu.memory_space<vmem>>, vector<1x1xf32>,
    %cst_63 = arith.constant dense<0.000000e+00> : vector<256xf32>
    %192 = vector.multi_reduction <add>, %1, %cst_63 [0] : vector<16x256xf32> to vector<256xf32>
    %193 = vector.shape_cast %192 : vector<256xf32> to vector<1x256xf32>
    %cst_64 = arith.constant 6.250000e-02 : f32
    %194 = vector.broadcast %cst_64 : f32 to vector<1x256xf32>
    %195 = arith.mulf %193, %194 : vector<1x256xf32>
    %cst_65 = arith.constant 0.899999976 : f32
    %196 = vector.broadcast %cst_65 : f32 to vector<1x256xf32>
    %197 = arith.mulf %0, %196 : vector<1x256xf32>
    %cst_66 = arith.constant 1.000000e-01 : f32
    %198 = vector.broadcast %cst_66 : f32 to vector<1x256xf32>
    %199 = arith.mulf %195, %198 : vector<1x256xf32>
    %200 = arith.addf %197, %199 : vector<1x256xf32>
    %c0_67 = arith.constant 0 : index
    %c0_68 = arith.constant 0 : index
    %201 = vector.load %arg9[%c0_67, %c0_68] : memref<1x256xf32, #tpu.memory_space<vmem>>, vector<1x256xf32>
    tpu.vector_store %arg9[%c0_67, %c0_68], %200 {strides = array<i32>} : memref<1x256xf32, #tpu.memory_space<vmem>>, vector<1x256xf32>,
    return
  }
}

</mosaic_0001>

<bundles_post_ra>
// kernel: tpu_custom_call.1
= control target key start
LH: loop header
LB: loop body
LE: loop exit
PB: predicated region body
PF: predicated region fallthrough
CT: control target
= control target key end

     0   :  { %15 = vsyncpa [#allocation3], 0  ;;  %s1149_s0 = inlined_call_operand.hbm [shape: f32[16,256], index: 0, kind: input, shape index: {}]   ;;  %s1150_s1 = inlined_call_operand.vmem [shape: f32[1,256], index: 1, kind: input, shape index: {}]   ;;  %s1151_s2 = inlined_call_operand.hbm [shape: f32[48,256], index: 2, kind: input, shape index: {}]   ;;  %s1152_s3 = inlined_call_operand.hbm [shape: f32[16,128], index: 3, kind: input, shape index: {}]   ;;  %s1153_s4 = inlined_call_operand.hbm [shape: f32[16,128], index: 4, kind: input, shape index: {}]   ;;  %s1154_s5 = inlined_call_operand.vmem [shape: f32[16,128], index: 5, kind: input, shape index: {}]   ;;  %s1155_s6 = inlined_call_operand.hbm [shape: f32[16,128], index: 6, kind: input, shape index: {}]   ;;  %s1156_s7 = inlined_call_operand.hbm [shape: f32[1,1], index: 7, kind: output, shape index: {0}]   ;;  %s1157_s8 = inlined_call_operand.hbm [shape: f32[1,1], index: 8, kind: output, shape index: {1}]   ;;  %s1158_s9 = inlined_call_operand.hbm [shape: f32[1,256], index: 9, kind: output, shape index: {2}]  }
   0x1   :  { %16 = vsyncpa [#allocation6], 0 }
   0x2   :  { %17 = vsyncpa [#allocation9], 0 }
   0x3   :  { %18 = vsyncpa [#allocation4], 0 }
   0x4   :  { %19 = vsyncpa [#allocation13], 0  ;;  %s820_s30 = smov [#allocation5]   ;;  %s634_s13 = scalar_lea.hbm %s1151_s2, 1536 }
   0x5   :  { %s39_s10 = sshll.u32 %s820_s30, 4  ;;  %p635_p0 = scmp.ne.s32.totalorder %s1151_s2, %s634_s13  ;;  %s40_s10 = int_to_ptr.vmem [resolvable:$true] %s39_s10 }
   0x6   :  { %p638_p1 = scmp.lt.u32.totalorder %s634_s13, %s1151_s2 }
   0x8   :  { %p640_p2 = pnand %p638_p1, %p635_p0 }
   0xa   :  { %643 = shalt.err (!%p640_p2)
}
   0xb   :  { %s644_s18 = scalar_lea.vmem %s40_s10, 1536  ;;  %p649_p4 = scmp.lt.s32.totalorder %s40_s10, %s40_s10 }
   0xc   :  { %p645_p3 = scmp.ne.s32.totalorder %s40_s10, %s644_s18  ;;  %p650_p5 = scmp.lt.s32.totalorder %s644_s18, %s644_s18 }
   0xe   :  { %p651_p6 = por %p650_p5, %p649_p4 }
  0x10   :  { %p652_p7 = pnand %p651_p6, %p645_p3 }
  0x12   :  { %655 = shalt.err (!%p652_p7)
}
  0x13   :  { %s821_s19 = smov 256   ;;  %s822_s20 = smov 16  }
  0x14   :  { %45 = dma.hbm_to_vmem [thread:$0]  %s1151_s2, 1536, %s40_s10, [#allocation6], %s821_s19, %s821_s19, %s822_s20  }
  0x15   :  { %s823_s23 = smov [#allocation8]   ;;  %s824_s25 = smov [#allocation2]  }
  0x16   :  { %s63_s24 = sshll.u32 %s823_s23, 4  ;;  %s25_s26 = sshll.u32 %s824_s25, 4  ;;  %s64_s24 = int_to_ptr.vmem [resolvable:$true] %s63_s24  ;;  %s26_s26 = int_to_ptr.vmem [resolvable:$true] %s25_s26 }
  0x17   :  { %s656_s29 = scalar_lea.hbm %s1153_s4, 256 }
  0x18   :  { %p657_p8 = scmp.ne.s32.totalorder %s1153_s4, %s656_s29  ;;  %p660_p9 = scmp.lt.u32.totalorder %s656_s29, %s1153_s4 }
  0x1a   :  { %p662_p10 = pnand %p660_p9, %p657_p8 }
  0x1c   :  { %665 = shalt.err (!%p662_p10)
}
  0x1d   :  { %s666_s2 = scalar_lea.vmem %s64_s24, 256  ;;  %p671_p12 = scmp.lt.s32.totalorder %s64_s24, %s64_s24 }
  0x1e   :  { %p667_p11 = scmp.ne.s32.totalorder %s64_s24, %s666_s2  ;;  %p672_p13 = scmp.lt.s32.totalorder %s666_s2, %s666_s2 }
  0x20   :  { %p673_p0 = por %p672_p13, %p671_p12 }
  0x22   :  { %p674_p1 = pnand %p673_p0, %p667_p11 }
  0x24   :  { %677 = shalt.err (!%p674_p1)
}
  0x25   :  { %s825_s10 = smov 128   ;;  %s826_s14 = smov 8  }
  0x26   :  { %69 = dma.hbm_to_vmem [thread:$0]  %s1153_s4, 256, %s64_s24, [#allocation9], %s825_s10, %s825_s10, %s826_s14  }
  0x27   :  { %s678_s21 = scalar_lea.hbm %s1149_s0, 512 }
  0x28   :  { %p679_p2 = scmp.ne.s32.totalorder %s1149_s0, %s678_s21  ;;  %p682_p3 = scmp.lt.u32.totalorder %s678_s21, %s1149_s0 }
  0x2a   :  { %p684_p4 = pnand %p682_p3, %p679_p2 }
  0x2c   :  { %687 = shalt.err (!%p684_p4)
}
  0x2d   :  { %s688_s28 = scalar_lea.vmem %s26_s26, 512  ;;  %p693_p6 = scmp.lt.s32.totalorder %s26_s26, %s26_s26 }
  0x2e   :  { %p689_p5 = scmp.ne.s32.totalorder %s26_s26, %s688_s28  ;;  %p694_p7 = scmp.lt.s32.totalorder %s688_s28, %s688_s28 }
  0x30   :  { %p695_p8 = por %p694_p7, %p693_p6 }
  0x32   :  { %p696_p9 = pnand %p695_p8, %p689_p5 }
  0x34   :  { %699 = shalt.err (!%p696_p9)
}
  0x35   :  { %31 = dma.hbm_to_vmem [thread:$0]  %s1149_s0, 512, %s26_s26, [#allocation3], %s821_s19, %s821_s19, %s822_s20  }
  0x36   :  { %s827_s29 = smov [#allocation7]   ;;  %s828_s11 = smov [#allocation10]  }
  0x37   :  { %s51_s30 = sshll.u32 %s827_s29, 4  ;;  %s77_s12 = sshll.u32 %s828_s11, 4  ;;  %s52_s30 = int_to_ptr.vmem [resolvable:$true] %s51_s30  ;;  %s78_s12 = int_to_ptr.vmem [resolvable:$true] %s77_s12 }
  0x38   :  { %s700_s15 = scalar_lea.hbm %s1152_s3, 256 }
  0x39   :  { %p701_p10 = scmp.ne.s32.totalorder %s1152_s3, %s700_s15  ;;  %p704_p11 = scmp.lt.u32.totalorder %s700_s15, %s1152_s3 }
  0x3b   :  { %p706_p12 = pnand %p704_p11, %p701_p10 }
  0x3d   :  { %709 = shalt.err (!%p706_p12)
}
  0x3e   :  { %s710_s0 = scalar_lea.vmem %s52_s30, 256  ;;  %p715_p0 = scmp.lt.s32.totalorder %s52_s30, %s52_s30 }
  0x3f   :  { %p711_p13 = scmp.ne.s32.totalorder %s52_s30, %s710_s0  ;;  %p716_p1 = scmp.lt.s32.totalorder %s710_s0, %s710_s0 }
  0x41   :  { %p717_p2 = por %p716_p1, %p715_p0 }
  0x43   :  { %p718_p3 = pnand %p717_p2, %p711_p13 }
  0x45   :  { %721 = shalt.err (!%p718_p3)
}
  0x46   :  { %57 = dma.hbm_to_vmem [thread:$0]  %s1152_s3, 256, %s52_s30, [#allocation6], %s825_s10, %s825_s10, %s826_s14  }
  0x47   :  { %s722_s23 = scalar_lea.hbm %s1155_s6, 256 }
  0x48   :  { %p723_p4 = scmp.ne.s32.totalorder %s1155_s6, %s722_s23  ;;  %p726_p5 = scmp.lt.u32.totalorder %s722_s23, %s1155_s6 }
  0x4a   :  { %p728_p6 = pnand %p726_p5, %p723_p4 }
  0x4c   :  { %731 = shalt.err (!%p728_p6)
}
  0x4d   :  { %s732_s24 = scalar_lea.vmem %s78_s12, 256  ;;  %p737_p8 = scmp.lt.s32.totalorder %s78_s12, %s78_s12 }
  0x4e   :  { %p733_p7 = scmp.ne.s32.totalorder %s78_s12, %s732_s24  ;;  %p738_p9 = scmp.lt.s32.totalorder %s732_s24, %s732_s24 }
  0x50   :  { %p739_p10 = por %p738_p9, %p737_p8 }
  0x52   :  { %p740_p11 = pnand %p739_p10, %p733_p7 }
  0x54   :  { %743 = shalt.err (!%p740_p11)
}
  0x55   :  { %83 = dma.hbm_to_vmem [thread:$0]  %s1155_s6, 256, %s78_s12, [#allocation9], %s825_s10, %s825_s10, %s826_s14  }
  0x56   :  { %810 = dma.done.wait [#allocation3], 512  }
  0x57   :  { %811 = vsyncadd [#allocation3], 4294966784 }
  0x58   :  { %812 = dma.done.wait [#allocation6], 1792  }
  0x59   :  { %813 = vsyncadd [#allocation6], 4294965504 }
  0x5a   :  { %814 = dma.done.wait [#allocation9], 512  }
  0x5b   :  { %815 = vsyncadd [#allocation9], 4294966784  ;;  %v105_v0 = vlaneseq  ;;  %v966_v4 = vld [vmem:[%s1150_s1] sm:$0x3]  ;;  %v101_v6 = vld [vmem:[#allocation2 + $0x8] sm:$0xff]  ;;  %s831_s13 = smov [#allocation14]  }
  0x5c   :  { %v100_v5 = vld [vmem:[#allocation2] sm:$0xff]  ;;  %v102_v7 = vld [vmem:[#allocation2 + $0x10] sm:$0xff]  ;;  %v103_v8 = vld [vmem:[#allocation2 + $0x18] sm:$0xff]  ;;  %s539_s2 = sshll.u32 %s831_s13, 4  ;;  %vm394_vm1 = vcmask 0   ;;  %s832_s15 = smov [#allocation11]   ;;  %s1096_s2 = int_to_ptr.vmem [resolvable:$true] %s539_s2 }
  0x5d   :  { %v959_v1 = vshrl.u32 %v105_v0, 7  ;;  %v157_v11 = vld [vmem:[#allocation5 + $0x10] sm:$0xff]  ;;  %v470_v12 = vadd.f32 %v102_v7, %v100_v5  ;;  %v477_v13 = vadd.f32 %v103_v8, %v101_v6  ;;  %v158_v14 = vld [vmem:[#allocation5 + $0x18] sm:$0xff]  ;;  %v159_v16 = vld [vmem:[#allocation5 + $0x20] sm:$0xff]  ;;  %vm510_vm0 = vcmp.lt.s32.totalorder %v105_v0, 256  ;;  %s519_s16 = sshll.u32 %s832_s15, 4  ;;  %s1099_s16 = int_to_ptr.vmem [resolvable:$true] %s519_s16 }
  0x5e   :  { %v970_v15 = vmul.f32 10.0, %v157_v11  ;;  %v160_v21 = vld [vmem:[#allocation5 + $0x28] sm:$0xff]  ;;  %v170_v24 = vmul.f32 10.0, %v158_v14  ;;  %v972_v25 = vmul.f32 10.0, %v159_v16  ;;  %v163_v26 = vld [vmem:[#allocation5 + $0x40] sm:$0xff]  ;;  %v161_v35 = vld [vmem:[#allocation5 + $0x30] sm:$0xff] }
  0x5f   :  { %v107_v2 = vsub.s32 0, %v959_v1  ;;  %v111_v3 = vsub.s32 1, %v959_v1  ;;  %v471_v22 = vrot.slane %v470_v12, 4  ;;  %v478_v23 = vrot.slane %v477_v13, 4  ;;  %v164_v27 = vld [vmem:[#allocation5 + $0x48] sm:$0xff]  ;;  %v162_v36 = vld [vmem:[#allocation5 + $0x38] sm:$0xff] }
  0x60   :  { %v182_v34 = vmax.f32 %v970_v15, %v170_v24  ;;  %v172_v38 = vmul.f32 10.0, %v160_v21  ;;  %v175_v41 = vmul.f32 10.0, %v163_v26  ;;  %v176_v42 = vmul.f32 10.0, %v164_v27  ;;  %v155_v60 = vld [vmem:[#allocation5] sm:$0xff]  ;;  %v156_v61 = vld [vmem:[#allocation5 + $0x8] sm:$0xff]  ;;  %v165_v62 = vld [vmem:[#allocation5 + $0x50] sm:$0xff] }
  0x61   :  { %v108_v9 = vrot.slane %v966_v4, %v107_v2  ;;  %v112_v10 = vrot.slane %v966_v4, %v111_v3  ;;  %v472_v31 = vadd.f32 %v471_v22, %v470_v12  ;;  %v479_v32 = vadd.f32 %v478_v23, %v477_v13  ;;  %v166_v3 = vld [vmem:[#allocation5 + $0x58] sm:$0xff] }
  0x62   :  { %183 = vmax.xlane.f32.xlu1 %v182_v34  ;;  %v185_v44 = vmax.f32 %v972_v25, %v172_v38  ;;  %v173_v45 = vmul.f32 10.0, %v161_v35  ;;  %v174_v46 = vmul.f32 10.0, %v162_v36  ;;  %v191_v51 = vmax.f32 %v175_v41, %v176_v42 }
  0x63   :  { %v115_v17 = vsub.f32 %v100_v5, %v108_v9  ;;  %v116_v18 = vsub.f32 %v101_v6, %v112_v10  ;;  %v117_v19 = vsub.f32 %v102_v7, %v108_v9  ;;  %v118_v20 = vsub.f32 %v103_v8, %v112_v10 }
  0x64   :  { %v473_v39 = vrot.slane %v472_v31, 2  ;;  %v480_v40 = vrot.slane %v479_v32, 2  ;;  %v188_v52 = vmax.f32 %v173_v45, %v174_v46  ;;  %v988_v63 = vmul.f32 10.0, %v155_v60 }
  0x65   :  { %v119_v28 = vmul.f32 18.181818, %v115_v17  ;;  %v120_v29 = vmul.f32 18.181818, %v116_v18  ;;  %v974_v30 = vmul.f32 18.181818, %v117_v19 }
  0x66   :  { %v976_v33 = vmul.f32 18.181818, %v118_v20  ;;  %v474_v47 = vadd.f32 %v473_v39, %v472_v31  ;;  %v481_v48 = vadd.f32 %v480_v40, %v479_v32  ;;  %186 = vmax.xlane.f32.xlu1 %v185_v44  ;;  %v990_v2 = vmul.f32 10.0, %v156_v61  ;;  %v402_v61 = vld [vmem:[#allocation10] sm:$0xff] }
  0x67   :  { %v123_v37 = vmax.f32 %v119_v28, %v120_v29  ;;  %v992_v5 = vmul.f32 10.0, %v165_v62  ;;  %v994_v6 = vmul.f32 10.0, %v166_v3 }
  0x68   :  { %v126_v43 = vmax.f32 %v974_v30, %v976_v33  ;;  %v475_v49 = vrot.slane %v474_v47, 1  ;;  %v482_v50 = vrot.slane %v481_v48, 1  ;;  %v179_v7 = vmax.f32 %v988_v63, %v990_v2 }
  0x69   :  { %124 = vmax.xlane.f32.xlu0 %v123_v37  ;;  %v194_v8 = vmax.f32 %v992_v5, %v994_v6 }
  0x6a   :  { %v476_v53 = vadd.f32 %v475_v49, %v474_v47  ;;  %v483_v54 = vadd.f32 %v482_v50, %v481_v48  ;;  %192 = vmax.xlane.f32.xlu1 %v191_v51 }
  0x6c   :  { %v484_v55 = vmul.f32 0.0625, %v476_v53  ;;  %v485_v56 = vmul.f32 0.0625, %v483_v54 }
  0x6d   :  { %127 = vmax.xlane.f32.xlu0 %v126_v43 }
  0x6e   :  { %v982_v57 = vmul.f32 0.1, %v484_v55  ;;  %v984_v58 = vmul.f32 0.1, %v485_v56  ;;  %180 = vmax.xlane.f32.xlu1 %v179_v7  ;;  %v400_v7 = vld [vmem:[%s1154_s5] sm:$0xff] }
  0x70   :  { %v491_v59 = vcombine.low %v982_v57, %v984_v58 }
  0x71   :  { %189 = vmax.xlane.f32.xlu0 %v188_v52 }
  0x75   :  { %195 = vmax.xlane.f32.xlu0 %v194_v8 }
  0xef   :  { %v184_v9 = vpop.xlane.xlu1 %183 }
  0xf0   :  { %v1001_v11 = vsub.f32 %v970_v15, %v184_v9  ;;  %v1003_v12 = vsub.f32 %v170_v24, %v184_v9 }
  0xf2   :  { %v213_v16 = vmul.f32 1.442695, %v1001_v11  ;;  %v215_v19 = vmul.f32 1.442695, %v1003_v12 }
  0xf3   :  { %v187_v20 = vpop.xlane.xlu1 %186 }
  0xf4   :  { %570 = vpow2.f32 %v213_v16  ;;  %v1008_v22 = vsub.f32 %v972_v25, %v187_v20  ;;  %v1010_v23 = vsub.f32 %v172_v38, %v187_v20  ;;  %v396_v38 = vld [vmem:[#allocation7] sm:$0xff]  ;;  %v405_v16 = vadd.f32 1e-10, %v400_v7 }
  0xf6   :  { %v125_v10 = vpop.xlane.xlu0 %124  ;;  %v217_v26 = vmul.f32 1.442695, %v1008_v22 }
  0xf7   :  { %v129_v13 = vsub.f32 %v119_v28, %v125_v10  ;;  %v130_v14 = vsub.f32 %v120_v29, %v125_v10  ;;  %v219_v29 = vmul.f32 1.442695, %v1010_v23  ;;  %v193_v31 = vpop.xlane.xlu1 %192 }
  0xf8   :  { %v1016_v32 = vsub.f32 %v175_v41, %v193_v31  ;;  %v1018_v25 = vsub.f32 %v176_v42, %v193_v31  ;;  %v404_v42 = vadd.f32 1e-10, %v396_v38 }
  0xf9   :  { %v133_v17 = vmul.f32 1.442695, %v129_v13  ;;  %v135_v18 = vmul.f32 1.442695, %v130_v14  ;;  %v421_v13 = vadd.f32 1e-10, %v402_v61 }
  0xfa   :  { %v128_v21 = vpop.xlane.xlu0 %127  ;;  %v225_v36 = vmul.f32 1.442695, %v1016_v32  ;;  %v227_v37 = vmul.f32 1.442695, %v1018_v25  ;;  %v403_v61 = vld [vmem:[#allocation10 + $0x8] sm:$0xff] }
  0xfb   :  { %572 = vpow2.f32 %v133_v17  ;;  %v131_v15 = vsub.f32 %v974_v30, %v128_v21  ;;  %v132_v24 = vsub.f32 %v976_v33, %v128_v21  ;;  %v398_v33 = vld [vmem:[#allocation8] sm:$0xff]  ;;  %v181_v49 = vpop.xlane.xlu1 %180 }
  0xfc   :  { %574 = vpow2.f32 %v135_v18  ;;  %v420_v41 = vadd.f32 1e-10, %v398_v33  ;;  %v1037_v51 = vsub.f32 %v988_v63, %v181_v49  ;;  %v1040_v52 = vsub.f32 %v990_v2, %v181_v49 }
  0xfd   :  { %v137_v27 = vmul.f32 1.442695, %v131_v15  ;;  %v139_v28 = vmul.f32 1.442695, %v132_v24  ;;  %576 = vpow2.f32 %v215_v19 }
  0xfe   :  { %578 = vpow2.f32 %v217_v26  ;;  %v190_v34 = vpop.xlane.xlu0 %189  ;;  %v571_v43 = vpop.eup %570  ;;  %v209_v63 = vmul.f32 1.442695, %v1037_v51  ;;  %v211_v2 = vmul.f32 1.442695, %v1040_v52 }
  0xff   :  { %580 = vpow2.f32 %v137_v27  ;;  %v1020_v35 = vsub.f32 %v173_v45, %v190_v34  ;;  %v1022_v30 = vsub.f32 %v174_v46, %v190_v34 }
 0x100   :  { %582 = vpow2.f32 %v139_v28 }
 0x101   :  { %584 = vpow2.f32 %v219_v29  ;;  %v221_v39 = vmul.f32 1.442695, %v1020_v35  ;;  %v223_v40 = vmul.f32 1.442695, %v1022_v30 }
 0x102   :  { %586 = vpow2.f32 %v225_v36  ;;  %v196_v53 = vpop.xlane.xlu0 %195 }
 0x103   :  { %588 = vpow2.f32 %v227_v37  ;;  %v1045_v56 = vsub.f32 %v992_v5, %v196_v53  ;;  %v1048_v60 = vsub.f32 %v994_v6, %v196_v53 }
 0x104   :  { %590 = vpow2.f32 %v221_v39 }
 0x105   :  { %v1028_v44 = vpop.eup %572  ;;  %592 = vpow2.f32 %v223_v40  ;;  %v229_v5 = vmul.f32 1.442695, %v1045_v56  ;;  %v231_v9 = vmul.f32 1.442695, %v1048_v60 }
 0x106   :  { %v1030_v45 = vpop.eup %574  ;;  %594 = vrcp.f32 %v420_v41  ;;  %v397_v41 = vld [vmem:[#allocation7 + $0x8] sm:$0xff] }
 0x107   :  { %v577_v46 = vpop.eup %576  ;;  %v141_v47 = vadd.f32 %v1030_v45, %v1028_v44  ;;  %596 = vrcp.f32 %v404_v42  ;;  %v436_v42 = vadd.f32 1e-10, %v397_v41 }
 0x108   :  { %v579_v48 = vpop.eup %578  ;;  %v236_v54 = vadd.f32 %v577_v46, %v571_v43  ;;  %598 = vpow2.f32 %v209_v63  ;;  %v399_v43 = vld [vmem:[#allocation8 + $0x8] sm:$0xff] }
 0x109   :  { %v1034_v50 = vpop.eup %580  ;;  %142 = vadd.xlane.f32.xlu0 %v141_v47  ;;  %600 = vpow2.f32 %v211_v2  ;;  %v452_v46 = vadd.f32 1e-10, %v399_v43  ;;  %v829_v43 = vmov 1966171168  }
 0x10a   :  { %v1042_v55 = vpop.eup %582  ;;  %602 = vpow2.f32 %v229_v5 }
 0x10b   :  { %v585_v62 = vpop.eup %584  ;;  %v144_v3 = vadd.f32 %v1042_v55, %v1034_v50  ;;  %604 = vpow2.f32 %v231_v9 }
 0x10c   :  { %v587_v8 = vpop.eup %586  ;;  %v239_v10 = vadd.f32 %v585_v62, %v579_v48  ;;  %v401_v48 = vld [vmem:[%s1154_s5 + $0x8] sm:$0xff]  ;;  %s830_s5 = smov [#allocation12]  }
 0x10d   :  { %v589_v6 = vpop.eup %588  ;;  %145 = vadd.xlane.f32.xlu1 %v144_v3  ;;  %237 = vadd.xlane.f32.xlu0 %v236_v54  ;;  %v437_v53 = vadd.f32 1e-10, %v401_v48  ;;  %v453_v3 = vadd.f32 1e-10, %v403_v61  ;;  %s529_s12 = sshll.u32 %s830_s5, 4  ;;  %s530_s12 = int_to_ptr.vmem [resolvable:$true] %s529_s12 }
 0x10e   :  { %v591_v14 = vpop.eup %590  ;;  %v245_v21 = vadd.f32 %v589_v6, %v587_v8  ;;  %s744_s17 = scalar_lea.vmem %s530_s12, 16  ;;  %s748_s18 = scalar_lea.vmem %s530_s12, 32 }
 0x10f   :  { %v593_v17 = vpop.eup %592  ;;  %p745_p12 = scmp.ne.s32.totalorder %s530_s12, %s744_s17  ;;  %p749_p13 = scmp.lt.s32.totalorder %s530_s12, %s530_s12 }
 0x110   :  { %v595_v18 = vpop.eup %594  ;;  %v242_v19 = vadd.f32 %v593_v17, %v591_v14  ;;  %p750_p0 = scmp.lt.s32.totalorder %s748_s18, %s744_s17 }
 0x111   :  { %v597_v20 = vpop.eup %596  ;;  %240 = vadd.xlane.f32.xlu1 %v239_v10  ;;  %v423_v15 = vmul.f32 %v595_v18, %v421_v13 }
 0x112   :  { %243 = vadd.xlane.f32.xlu0 %v242_v19  ;;  %v407_v24 = vmul.f32 %v597_v20, %v405_v16  ;;  %v599_v26 = vpop.eup %598  ;;  %p751_p1 = por %p750_p0, %p749_p13 }
 0x113   :  { %606 = vlog2.f32 %v423_v15  ;;  %v601_v27 = vpop.eup %600 }
 0x114   :  { %608 = vlog2.f32 %v407_v24  ;;  %v603_v28 = vpop.eup %602  ;;  %v233_v29 = vadd.f32 %v601_v27, %v599_v26  ;;  %p752_p2 = pnand %p751_p1, %p745_p12 }
 0x115   :  { %246 = vadd.xlane.f32.xlu1 %v245_v21  ;;  %v605_v31 = vpop.eup %604  ;;  %610 = vrcp.f32 %v436_v42 }
 0x116   :  { %v248_v34 = vadd.f32 %v605_v31, %v603_v28  ;;  %612 = vrcp.f32 %v452_v46  ;;  %v493_v46 = vunpack.c.l.s4 %v829_v43 }
 0x118   :  { %249 = vadd.xlane.f32.xlu0 %v248_v34 }
 0x119   :  { %234 = vadd.xlane.f32.xlu1 %v233_v29 }
 0x11d   :  { %v607_v33 = vpop.eup %606 }
 0x11e   :  { %v609_v36 = vpop.eup %608  ;;  %v425_v37 = vmul.f32 0.6931472, %v607_v33 }
 0x11f   :  { %v409_v38 = vmul.f32 0.6931472, %v609_v36  ;;  %v611_v54 = vpop.eup %610 }
 0x120   :  { %v426_v39 = vmul.f32 %v425_v37, %v421_v13  ;;  %v439_v62 = vmul.f32 %v611_v54, %v437_v53  ;;  %v613_v63 = vpop.eup %612 }
 0x121   :  { %v410_v40 = vmul.f32 %v409_v38, %v405_v16  ;;  %v455_v5 = vmul.f32 %v613_v63, %v453_v3 }
 0x122   :  { %427 = vadd.xlane.f32.xlu1 %v426_v39 }
 0x123   :  { %411 = vadd.xlane.f32.xlu0 %v410_v40 }
 0x196   :  { %v143_v47 = vpop.xlane.xlu0 %142 }
 0x197   :  { %614 = vrcp.f32 %v143_v47  ;;  %v486_v47 = vmul.f32 0.9, %v966_v4 }
 0x19a   :  { %v146_v49 = vpop.xlane.xlu1 %145 }
 0x19b   :  { %616 = vrcp.f32 %v146_v49 }
 0x19c   :  { %618 = vlog2.f32 %v439_v62 }
 0x19d   :  { %620 = vlog2.f32 %v455_v5 }
 0x1a1   :  { %v615_v2 = vpop.eup %614 }
 0x1a2   :  { %v151_v7 = vmul.f32 %v615_v2, %v1028_v44  ;;  %v152_v8 = vmul.f32 %v615_v2, %v1030_v45 }
 0x1a4   :  { %v276_v9 = vmul.f32 %v1008_v22, %v151_v7  ;;  %v277_v6 = vmul.f32 %v1010_v23, %v152_v8  ;;  %v263_v10 = vmul.f32 %v1001_v11, %v151_v7  ;;  %v264_v13 = vmul.f32 %v1003_v12, %v152_v8 }
 0x1a5   :  { %v617_v14 = vpop.eup %616  ;;  %v302_v16 = vmul.f32 %v1016_v32, %v151_v7  ;;  %v303_v17 = vmul.f32 %v1018_v25, %v152_v8  ;;  %v289_v18 = vmul.f32 %v1020_v35, %v151_v7  ;;  %v290_v44 = vmul.f32 %v1022_v30, %v152_v8 }
 0x1a6   :  { %v153_v45 = vmul.f32 %v617_v14, %v1034_v50  ;;  %v154_v19 = vmul.f32 %v617_v14, %v1042_v55  ;;  %v278_v20 = vadd.f32 %v277_v6, %v276_v9  ;;  %v265_v21 = vadd.f32 %v264_v13, %v263_v10  ;;  %v619_v50 = vpop.eup %618 }
 0x1a7   :  { %v315_v11 = vmul.f32 %v1045_v56, %v151_v7  ;;  %v316_v12 = vmul.f32 %v1048_v60, %v152_v8  ;;  %v304_v15 = vadd.f32 %v303_v17, %v302_v16  ;;  %v291_v24 = vadd.f32 %v290_v44, %v289_v18  ;;  %v621_v37 = vpop.eup %620 }
 0x1a8   :  { %279 = vadd.xlane.f32.xlu1 %v278_v20  ;;  %266 = vadd.xlane.f32.xlu0 %v265_v21  ;;  %v328_v26 = vmul.f32 %v1037_v51, %v153_v45  ;;  %v329_v27 = vmul.f32 %v1040_v52, %v154_v19  ;;  %v354_v55 = vmul.f32 %v1020_v35, %v153_v45  ;;  %v441_v36 = vmul.f32 0.6931472, %v619_v50 }
 0x1a9   :  { %v317_v28 = vadd.f32 %v316_v12, %v315_v11  ;;  %v355_v31 = vmul.f32 %v1022_v30, %v154_v19  ;;  %v341_v34 = vmul.f32 %v1008_v22, %v153_v45  ;;  %v342_v33 = vmul.f32 %v1010_v23, %v154_v19 }
 0x1aa   :  { %v330_v29 = vadd.f32 %v329_v27, %v328_v26  ;;  %v367_v52 = vmul.f32 %v1016_v32, %v153_v45  ;;  %v368_v39 = vmul.f32 %v1018_v25, %v154_v19  ;;  %v442_v35 = vmul.f32 %v441_v36, %v437_v53  ;;  %v238_v53 = vpop.xlane.xlu0 %237 }
 0x1ab   :  { %v356_v51 = vadd.f32 %v355_v31, %v354_v55  ;;  %v343_v38 = vadd.f32 %v342_v33, %v341_v34  ;;  %v457_v40 = vmul.f32 0.6931472, %v621_v37  ;;  %v380_v30 = vmul.f32 %v1045_v56, %v153_v45 }
 0x1ac   :  { %305 = vadd.xlane.f32.xlu1 %v304_v15  ;;  %292 = vadd.xlane.f32.xlu0 %v291_v24  ;;  %v369_v41 = vadd.f32 %v368_v39, %v367_v52  ;;  %v381_v22 = vmul.f32 %v1048_v60, %v154_v19  ;;  %v494_v32 = vunpack.c.0.s8 %v493_v46  ;;  %v241_v60 = vpop.xlane.xlu1 %240  ;;  %622 = vlog2.f32 %v238_v53 }
 0x1ad   :  { %v458_v23 = vmul.f32 %v457_v40, %v453_v3  ;;  %624 = vlog2.f32 %v241_v60 }
 0x1ae   :  { %v382_v42 = vadd.f32 %v381_v22, %v380_v30  ;;  %v497_v25 = vsub.s32 %v494_v32, %v959_v1  ;;  %v244_v61 = vpop.xlane.xlu0 %243 }
 0x1af   :  { %626 = vlog2.f32 %v244_v61 }
 0x1b0   :  { %331 = vadd.xlane.f32.xlu1 %v330_v29  ;;  %318 = vadd.xlane.f32.xlu0 %v317_v28  ;;  %v498_v48 = vrot.slane %v491_v59, %v497_v25  ;;  %v247_v54 = vpop.xlane.xlu1 %246 }
 0x1b1   :  { %628 = vlog2.f32 %v247_v54 }
 0x1b2   :  { %v505_v56 = vrot.slane %v498_v48, %v497_v25  ;;  %v250_v1 = vpop.xlane.xlu0 %249 }
 0x1b4   :  { %357 = vadd.xlane.f32.xlu1 %v356_v51  ;;  %344 = vadd.xlane.f32.xlu0 %v343_v38  ;;  %v507_v49 = vadd.f32 %v505_v56, %v486_v47  ;;  %v235_v62 = vpop.xlane.xlu1 %234 }
 0x1b5   :  { %630 = vlog2.f32 %v235_v62 }
 0x1b6   :  { %512 = vst.msk [vmem:[#allocation14] sm:$0x3] %vm510_vm0, %v507_v49  ;;  %v623_v57 = vpop.eup %622  ;;  %632 = vlog2.f32 %v250_v1  ;;  %v412_v58 = vpop.xlane.xlu0 %411 }
 0x1b7   :  { %v625_v59 = vpop.eup %624  ;;  %v413_v0 = vrot.slane %v412_v58, 4  ;;  %v254_v8 = vmul.f32 0.6931472, %v623_v57 }
 0x1b8   :  { %443 = vadd.xlane.f32.xlu1 %v442_v35  ;;  %370 = vadd.xlane.f32.xlu0 %v369_v41  ;;  %v428_v4 = vpop.xlane.xlu1 %427  ;;  %v256_v7 = vmul.f32 0.6931472, %v625_v59 }
 0x1b9   :  { %v429_v3 = vrot.slane %v428_v4, 4  ;;  %v627_v2 = vpop.eup %626  ;;  %v414_v16 = vadd.f32 %v413_v0, %v412_v58 }
 0x1ba   :  { %v258_v45 = vmul.f32 0.6931472, %v627_v2 }
 0x1bb   :  { %v430_v63 = vadd.f32 %v429_v3, %v428_v4  ;;  %v629_v5 = vpop.eup %628  ;;  %v415_v50 = vrot.slane %v414_v16, 2 }
 0x1bc   :  { %459 = vadd.xlane.f32.xlu1 %v458_v23  ;;  %383 = vadd.xlane.f32.xlu0 %v382_v42  ;;  %v260_v44 = vmul.f32 0.6931472, %v629_v5 }
 0x1bd   :  { %v431_v14 = vrot.slane %v430_v63, 2  ;;  %v416_v40 = vadd.f32 %v415_v50, %v414_v16 }
 0x1bf   :  { %v631_v19 = vpop.eup %630  ;;  %v432_v27 = vadd.f32 %v431_v14, %v430_v63  ;;  %v417_v4 = vrot.slane %v416_v40, 1 }
 0x1c0   :  { %v633_v11 = vpop.eup %632  ;;  %v252_v34 = vmul.f32 0.6931472, %v631_v19 }
 0x1c1   :  { %v1092_v36 = vmul.f32 0.6931472, %v633_v11  ;;  %v433_v35 = vrot.slane %v432_v27, 1 }
 0x1c3   :  { %v434_v1 = vadd.f32 %v433_v35, %v432_v27 }
 0x235   :  { %v280_v9 = vpop.xlane.xlu1 %279  ;;  %v267_v6 = vpop.xlane.xlu0 %266 }
 0x236   :  { %v281_v10 = vsub.f32 %v256_v7, %v280_v9  ;;  %v268_v13 = vsub.f32 %v254_v8, %v267_v6 }
 0x238   :  { %v282_v17 = vrot.slane %v281_v10, 4  ;;  %v269_v18 = vrot.slane %v268_v13, 4 }
 0x239   :  { %v306_v20 = vpop.xlane.xlu1 %305  ;;  %v293_v21 = vpop.xlane.xlu0 %292 }
 0x23a   :  { %v283_v12 = vadd.f32 %v282_v17, %v281_v10  ;;  %v270_v15 = vadd.f32 %v269_v18, %v268_v13  ;;  %v307_v24 = vsub.f32 %v260_v44, %v306_v20  ;;  %v294_v26 = vsub.f32 %v258_v45, %v293_v21 }
 0x23c   :  { %v284_v28 = vrot.slane %v283_v12, 2  ;;  %v271_v55 = vrot.slane %v270_v15, 2  ;;  %v308_v29 = vrot.slane %v307_v24, 4  ;;  %v295_v31 = vrot.slane %v294_v26, 4 }
 0x23d   :  { %v332_v33 = vpop.xlane.xlu1 %331  ;;  %v319_v37 = vpop.xlane.xlu0 %318 }
 0x23e   :  { %v285_v51 = vadd.f32 %v284_v28, %v283_v12  ;;  %v272_v38 = vadd.f32 %v271_v55, %v270_v15  ;;  %v309_v52 = vadd.f32 %v308_v29, %v307_v24  ;;  %v296_v39 = vadd.f32 %v295_v31, %v294_v26 }
 0x23f   :  { %v333_v41 = vsub.f32 %v252_v34, %v332_v33  ;;  %v320_v30 = vsub.f32 %v1092_v36, %v319_v37  ;;  %v418_v55 = vadd.f32 %v417_v4, %v416_v40 }
 0x240   :  { %v286_v22 = vrot.slane %v285_v51, 1  ;;  %v273_v23 = vrot.slane %v272_v38, 1  ;;  %v310_v42 = vrot.slane %v309_v52, 2  ;;  %v297_v43 = vrot.slane %v296_v39, 2 }
 0x241   :  { %v334_v46 = vrot.slane %v333_v41, 4  ;;  %v321_v32 = vrot.slane %v320_v30, 4  ;;  %v358_v25 = vpop.xlane.xlu1 %357  ;;  %v345_v47 = vpop.xlane.xlu0 %344 }
 0x242   :  { %v287_v48 = vadd.f32 %v286_v22, %v285_v51  ;;  %v274_v56 = vadd.f32 %v273_v23, %v272_v38  ;;  %v311_v49 = vadd.f32 %v310_v42, %v309_v52  ;;  %v298_v60 = vadd.f32 %v297_v43, %v296_v39 }
 0x243   :  { %v335_v53 = vadd.f32 %v334_v46, %v333_v41  ;;  %v322_v54 = vadd.f32 %v321_v32, %v320_v30  ;;  %v359_v61 = vsub.f32 %v258_v45, %v358_v25  ;;  %v346_v62 = vsub.f32 %v256_v7, %v345_v47 }
 0x244   :  { %v312_v3 = vrot.slane %v311_v49, 1  ;;  %v299_v57 = vrot.slane %v298_v60, 1  ;;  %v288_v5 = vadd.f32 %v287_v48, %v274_v56  ;;  %v435_v47 = vadd.f32 %v434_v1, %v418_v55 }
 0x245   :  { %v336_v58 = vrot.slane %v335_v53, 2  ;;  %v323_v59 = vrot.slane %v322_v54, 2  ;;  %v360_v63 = vrot.slane %v359_v61, 4  ;;  %v347_v0 = vrot.slane %v346_v62, 4  ;;  %v444_v2 = vpop.xlane.xlu1 %443  ;;  %v371_v8 = vpop.xlane.xlu0 %370 }
 0x246   :  { %v300_v9 = vadd.f32 %v299_v57, %v298_v60  ;;  %v445_v6 = vrot.slane %v444_v2, 4  ;;  %v372_v10 = vsub.f32 %v260_v44, %v371_v8  ;;  %v313_v18 = vadd.f32 %v312_v3, %v311_v49 }
 0x247   :  { %v337_v13 = vadd.f32 %v336_v58, %v335_v53  ;;  %v324_v14 = vadd.f32 %v323_v59, %v322_v54  ;;  %v361_v16 = vadd.f32 %v360_v63, %v359_v61  ;;  %v348_v17 = vadd.f32 %v347_v0, %v346_v62 }
 0x248   :  { %v301_v7 = vadd.f32 %v300_v9, %v288_v5  ;;  %v446_v45 = vadd.f32 %v445_v6, %v444_v2  ;;  %v373_v19 = vrot.slane %v372_v10, 4 }
 0x249   :  { %v338_v20 = vrot.slane %v337_v13, 1  ;;  %v325_v21 = vrot.slane %v324_v14, 1  ;;  %v362_v11 = vrot.slane %v361_v16, 2  ;;  %v349_v12 = vrot.slane %v348_v17, 2  ;;  %v460_v15 = vpop.xlane.xlu1 %459  ;;  %v384_v24 = vpop.xlane.xlu0 %383 }
 0x24a   :  { %v314_v26 = vadd.f32 %v313_v18, %v301_v7  ;;  %v447_v27 = vrot.slane %v446_v45, 2  ;;  %v374_v50 = vadd.f32 %v373_v19, %v372_v10  ;;  %v461_v28 = vrot.slane %v460_v15, 4 }
 0x24b   :  { %v326_v44 = vadd.f32 %v325_v21, %v324_v14  ;;  %v363_v29 = vadd.f32 %v362_v11, %v361_v16  ;;  %v350_v31 = vadd.f32 %v349_v12, %v348_v17  ;;  %v385_v51 = vsub.f32 %v1092_v36, %v384_v24 }
 0x24c   :  { %v448_v34 = vadd.f32 %v447_v27, %v446_v45  ;;  %v375_v33 = vrot.slane %v374_v50, 2  ;;  %v462_v37 = vadd.f32 %v461_v28, %v460_v15  ;;  %v339_v38 = vadd.f32 %v338_v20, %v337_v13 }
 0x24d   :  { %v327_v52 = vadd.f32 %v326_v44, %v314_v26  ;;  %v364_v39 = vrot.slane %v363_v29, 1  ;;  %v351_v35 = vrot.slane %v350_v31, 1  ;;  %v386_v23 = vrot.slane %v385_v51, 4 }
 0x24e   :  { %v449_v41 = vrot.slane %v448_v34, 1  ;;  %v376_v30 = vadd.f32 %v375_v33, %v374_v50  ;;  %v463_v22 = vrot.slane %v462_v37, 2 }
 0x24f   :  { %v340_v42 = vadd.f32 %v339_v38, %v327_v52  ;;  %v352_v43 = vadd.f32 %v351_v35, %v350_v31  ;;  %v387_v25 = vadd.f32 %v386_v23, %v385_v51  ;;  %v365_v56 = vadd.f32 %v364_v39, %v363_v29 }
 0x250   :  { %v450_v46 = vadd.f32 %v449_v41, %v448_v34  ;;  %v377_v40 = vrot.slane %v376_v30, 1  ;;  %v464_v32 = vadd.f32 %v463_v22, %v462_v37 }
 0x251   :  { %v353_v48 = vadd.f32 %v352_v43, %v340_v42  ;;  %v388_v60 = vrot.slane %v387_v25, 2 }
 0x252   :  { %v465_v49 = vrot.slane %v464_v32, 1  ;;  %v451_v36 = vadd.f32 %v450_v46, %v435_v47  ;;  %v378_v54 = vadd.f32 %v377_v40, %v376_v30 }
 0x253   :  { %v366_v53 = vadd.f32 %v365_v56, %v353_v48  ;;  %v389_v62 = vadd.f32 %v388_v60, %v387_v25 }
 0x254   :  { %v466_v61 = vadd.f32 %v465_v49, %v464_v32 }
 0x255   :  { %v390_v3 = vrot.slane %v389_v62, 1  ;;  %v379_v57 = vadd.f32 %v378_v54, %v366_v53 }
 0x256   :  { %v467_v4 = vadd.f32 %v466_v61, %v451_v36 }
 0x257   :  { %v391_v1 = vadd.f32 %v390_v3, %v389_v62 }
 0x258   :  { %v468_v58 = vmul.f32 0.0625, %v467_v4 }
 0x259   :  { %v392_v59 = vadd.f32 %v391_v1, %v379_v57 }
 0x25a   :  { %469 = vst.msk [vmem:[#allocation12] sm:$0x1] %vm394_vm1, %v468_v58 }
 0x25b   :  { %755 = shalt.err (!%p752_p2)
}
 0x25c   :  { %s756_s19 = scalar_lea.hbm %s1157_s8, 16 }
 0x25d   :  { %p757_p3 = scmp.ne.s32.totalorder %s1157_s8, %s756_s19  ;;  %p760_p4 = scmp.lt.u32.totalorder %s756_s19, %s1157_s8 }
 0x25f   :  { %p762_p5 = pnand %p760_p4, %p757_p3 }
 0x261   :  { %765 = shalt.err (!%p762_p5)
}
 0x262   :  { %532 = dma.vmem_to_hbm [thread:$0]  %s530_s12, 16, %s1157_s8, [#allocation13]   ;;  %v393_v63 = vmul.f32 0.0125, %v392_v59 }
 0x263   :  { %s766_s28 = scalar_lea.vmem %s1096_s2, 32  ;;  %p771_p7 = scmp.lt.s32.totalorder %s1096_s2, %s1096_s2 }
 0x264   :  { %p767_p6 = scmp.ne.s32.totalorder %s1096_s2, %s766_s28  ;;  %p772_p8 = scmp.lt.s32.totalorder %s766_s28, %s766_s28 }
 0x266   :  { %p773_p9 = por %p772_p8, %p771_p7 }
 0x268   :  { %p774_p10 = pnand %p773_p9, %p767_p6 }
 0x26a   :  { %777 = shalt.err (!%p774_p10)
}
 0x26b   :  { %s778_s3 = scalar_lea.hbm %s1158_s9, 32 }
 0x26c   :  { %p779_p11 = scmp.ne.s32.totalorder %s1158_s9, %s778_s3  ;;  %p782_p12 = scmp.lt.u32.totalorder %s778_s3, %s1158_s9 }
 0x26e   :  { %p784_p13 = pnand %p782_p12, %p779_p11 }
 0x270   :  { %787 = shalt.err (!%p784_p13)
}
 0x271   :  { %542 = dma.vmem_to_hbm [thread:$0]  %s1096_s2, 32, %s1158_s9, [#allocation13]   ;;  %395 = vst.msk [vmem:[#allocation11] sm:$0x1] %vm394_vm1, %v393_v63 }
 0x272   :  { %s788_s10 = scalar_lea.vmem %s1099_s16, 16  ;;  %s792_s14 = scalar_lea.vmem %s1099_s16, 32 }
 0x273   :  { %p789_p0 = scmp.ne.s32.totalorder %s1099_s16, %s788_s10  ;;  %p793_p1 = scmp.lt.s32.totalorder %s1099_s16, %s1099_s16 }
 0x274   :  { %p794_p2 = scmp.lt.s32.totalorder %s792_s14, %s788_s10 }
 0x276   :  { %p795_p3 = por %p794_p2, %p793_p1 }
 0x278   :  { %p796_p4 = pnand %p795_p3, %p789_p0 }
 0x27a   :  { %799 = shalt.err (!%p796_p4)
}
 0x27b   :  { %s800_s13 = scalar_lea.hbm %s1156_s7, 16 }
 0x27c   :  { %p801_p5 = scmp.ne.s32.totalorder %s1156_s7, %s800_s13  ;;  %p804_p6 = scmp.lt.u32.totalorder %s800_s13, %s1156_s7 }
 0x27e   :  { %p806_p7 = pnand %p804_p6, %p801_p5 }
 0x280   :  { %809 = shalt.err (!%p806_p7)
}
 0x281   :  { %522 = dma.vmem_to_hbm [thread:$0]  %s1099_s16, 16, %s1156_s7, [#allocation4]  }
 0x282   :  { %816 = dma.done.wait [#allocation4], 16  }
 0x283   :  { %817 = vsyncadd [#allocation4], 4294967280 }
 0x284   :  { %818 = dma.done.wait [#allocation13], 48  }
 0x285   :  { %819 = vsyncadd [#allocation13], 4294967248 }
 0x286   :  { %552 = vsyncpa [#allocation3], 1 }
 0x287   :  { %553 = vsyncpa [#allocation6], 1 }
 0x288   :  { %554 = vsyncpa [#allocation9], 1 }
 0x289   :  { %555 = vsyncpa [#allocation4], 1 }
 0x28a   :  { %556 = vsyncpa [#allocation13], 1 }

</bundles_post_ra>
